<compile_context>
chip_gen: v7x
topology: tpu7x:2x2x1
jax: 0.10.0
libtpu: 0.0.40
codegen_flags: <defaults>
</compile_context>

<pallas_src>
import jax
import jax.numpy as jnp
from jax.experimental import pallas as pl
from jax.experimental.pallas import tpu as pltpu

LAYER_DIMS = [512, 1024, 256]   # from the reference module
OUT_DIM = 10
D_IN = LAYER_DIMS[1]            # 1024 (input to layer2)
D_HID = LAYER_DIMS[2]           # 256
D_OUT = OUT_DIM                 # 10
D_OUT_PAD = 128                 # lane-dense padded output width

# Default batch tile: 1024 rows -> 4 MiB f32 x-tile (8 MiB double-buffered),
# large enough to amortize the ~0.35 us per-grid-step overhead, small enough
# to leave plenty of headroom in the 32 MiB scoped VMEM budget.
DEFAULT_TILE_B = 1024


def _round_up(n, m):
    return ((n + m - 1) // m) * m


def _model_chunk2_kernel(x_ref, w1_ref, b1_ref, w2_ref, b2_ref, o_ref):
    # Linear(1024 -> 256) + bias + relu, accumulated in f32 on the MXU/VPU.
    h = jnp.dot(x_ref[...], w1_ref[...], preferred_element_type=jnp.float32)
    h = jnp.maximum(h + b1_ref[...], 0.0)                 # b1_ref: (1, D_HID)
    # Output projection (256 -> 128 padded) + bias.
    y = jnp.dot(h, w2_ref[...], preferred_element_type=jnp.float32)
    o_ref[...] = (y + b2_ref[...]).astype(o_ref.dtype)    # b2_ref: (1, D_OUT_PAD)


def model_chunk2(x, w1, b1, w2, b2, *, tile_b=DEFAULT_TILE_B):
    """x: [B, D_IN]; w1: [D_IN, D_HID]; b1: [D_HID]; w2: [D_HID, D_OUT]; b2: [D_OUT].

    Weights are in transposed torch layout ([in_features, out_features]) so the
    kernel does plain row-major matmuls on the MXU.
    """
    B, d_in = x.shape
    d_hid = w1.shape[1]
    d_out = w2.shape[1]

    # Batch tile: at most `tile_b`, at least the (sublane-rounded) batch,
    # always a multiple of 8.
    tile_b = max(8, min(_round_up(tile_b, 8), _round_up(B, 8)))
    b_pad = _round_up(B, tile_b)

    # Wrapper-side padding: batch -> multiple of tile_b, output features -> 128.
    x_p = x if b_pad == B else jnp.pad(x, ((0, b_pad - B), (0, 0)))
    w2_p = jnp.pad(w2, ((0, 0), (0, D_OUT_PAD - d_out)))
    b2_p = jnp.pad(b2, (0, D_OUT_PAD - d_out)).reshape(1, D_OUT_PAD)
    b1_2d = b1.reshape(1, d_hid)

    grid = (b_pad // tile_b,)

    flops = 2 * b_pad * (d_in * d_hid + d_hid * D_OUT_PAD)
    bytes_accessed = 4 * (x_p.size + w1.size + b1.size + w2_p.size
                          + b2_p.size + b_pad * D_OUT_PAD)

    out = pl.pallas_call(
        _model_chunk2_kernel,
        out_shape=jax.ShapeDtypeStruct((b_pad, D_OUT_PAD), jnp.float32),
        grid=grid,
        in_specs=[
            # x: streamed / double-buffered per batch tile.
            pl.BlockSpec((tile_b, d_in), lambda i: (i, 0)),
            # Weights & biases: constant index_map -> loaded once, VMEM-resident.
            pl.BlockSpec((d_in, d_hid), lambda i: (0, 0)),
            pl.BlockSpec((1, d_hid), lambda i: (0, 0)),
            pl.BlockSpec((d_hid, D_OUT_PAD), lambda i: (0, 0)),
            pl.BlockSpec((1, D_OUT_PAD), lambda i: (0, 0)),
        ],
        out_specs=pl.BlockSpec((tile_b, D_OUT_PAD), lambda i: (i, 0)),
        compiler_params=pltpu.CompilerParams(
            dimension_semantics=("parallel",),
            vmem_limit_bytes=32 * 1024 * 1024,
        ),
        cost_estimate=pl.CostEstimate(
            flops=flops, transcendentals=0, bytes_accessed=bytes_accessed),
    )(x_p, w1, b1_2d, w2_p, b2_p)

    # Strip batch padding and the lane padding of the output projection.
    return out[:B, :d_out]


def _reference(x, w1, b1, w2, b2):
    h = jnp.maximum(x @ w1 + b1, 0.0)
    return h @ w2 + b2


if __name__ == "__main__":
    key = jax.random.PRNGKey(0)
    kx, kw1, kb1, kw2, kb2, kx2 = jax.random.split(key, 6)

    # Deterministic params (uniform like torch.nn.Linear default, bound 1/sqrt(fan_in)).
    bound1 = 1.0 / (D_IN ** 0.5)
    bound2 = 1.0 / (D_HID ** 0.5)
    w1 = jax.random.uniform(kw1, (D_IN, D_HID), jnp.float32, -bound1, bound1)
    b1 = jax.random.uniform(kb1, (D_HID,), jnp.float32, -bound1, bound1)
    w2 = jax.random.uniform(kw2, (D_HID, D_OUT), jnp.float32, -bound2, bound2)
    b2 = jax.random.uniform(kb2, (D_OUT,), jnp.float32, -bound2, bound2)

    # Small batch (single-tile path).
    B = 8
    x = jax.random.normal(kx, (B, D_IN), jnp.float32)
    out = jax.block_until_ready(model_chunk2(x, w1, b1, w2, b2))
    ref = _reference(x, w1, b1, w2, b2)
    assert out.shape == (B, D_OUT)
    assert jnp.allclose(out, ref, atol=1e-4, rtol=1e-4), "mismatch vs reference (B=8)"

    # Non-multiple batch with a small explicit tile to exercise the grid +
    # batch-padding path (40 rows, tile 16 -> grid of 3 with a padded last tile).
    B2 = 40
    x2 = jax.random.normal(kx2, (B2, D_IN), jnp.float32)
    out2 = jax.block_until_ready(model_chunk2(x2, w1, b1, w2, b2, tile_b=16))
    ref2 = _reference(x2, w1, b1, w2, b2)
    assert out2.shape == (B2, D_OUT)
    assert jnp.allclose(out2, ref2, atol=1e-4, rtol=1e-4), "mismatch vs reference (B=40)"

    print("KERNEL_OK")
</pallas_src>

<mosaic_0001>
module attributes {stable_mosaic.version = 11 : i64} {
  func.func @_model_chunk2_kernel(%arg0: i32, %arg1: memref<8x1024xf32, #tpu.memory_space<vmem>>, %arg2: memref<1024x256xf32, #tpu.memory_space<vmem>>, %arg3: memref<1x256xf32, #tpu.memory_space<vmem>>, %arg4: memref<256x128xf32, #tpu.memory_space<vmem>>, %arg5: memref<1x128xf32, #tpu.memory_space<vmem>>, %arg6: memref<8x128xf32, #tpu.memory_space<vmem>>) attributes {dimension_semantics = [#tpu.dimension_semantics<parallel>], iteration_bounds = array<i64: 1>, scalar_prefetch = 0 : i64, scratch_operands = 0 : i64, tpu.core_type = #tpu.core_type<tc>, window_params = [{transform_indices = @transform_0, window_bounds = array<i64: 8, 1024>}, {pipeline_mode = #tpu.pipeline_mode<synchronous>, transform_indices = @transform_1, window_bounds = array<i64: 1024, 256>}, {pipeline_mode = #tpu.pipeline_mode<synchronous>, transform_indices = @transform_2, window_bounds = array<i64: 1, 256>}, {pipeline_mode = #tpu.pipeline_mode<synchronous>, transform_indices = @transform_3, window_bounds = array<i64: 256, 128>}, {pipeline_mode = #tpu.pipeline_mode<synchronous>, transform_indices = @transform_4, window_bounds = array<i64: 1, 128>}, {transform_indices = @transform_5, window_bounds = array<i64: 8, 128>}]} {
    %c0 = arith.constant 0 : index
    %c0_0 = arith.constant 0 : index
    %0 = vector.load %arg1[%c0, %c0_0] : memref<8x1024xf32, #tpu.memory_space<vmem>>, vector<8x1024xf32>
    %c0_1 = arith.constant 0 : index
    %c0_2 = arith.constant 0 : index
    %1 = vector.load %arg2[%c0_1, %c0_2] : memref<1024x256xf32, #tpu.memory_space<vmem>>, vector<1024x256xf32>
    %cst = arith.constant dense<0.000000e+00> : vector<8x256xf32>
    %2 = tpu.matmul %0, %1, %cst {dimension_numbers = #tpu.dot_dimension_numbers<[1], [0], [0], [1], [0, 0, 1, 1], [], []>} : vector<8x1024xf32>, vector<1024x256xf32>, vector<8x256xf32> -> vector<8x256xf32>
    %c0_3 = arith.constant 0 : index
    %c0_4 = arith.constant 0 : index
    %3 = vector.load %arg3[%c0_3, %c0_4] : memref<1x256xf32, #tpu.memory_space<vmem>>, vector<1x256xf32>
    %4 = vector.broadcast %3 : vector<1x256xf32> to vector<8x256xf32>
    %5 = arith.addf %2, %4 : vector<8x256xf32>
    %cst_5 = arith.constant 0.000000e+00 : f32
    %6 = vector.broadcast %cst_5 : f32 to vector<8x256xf32>
    %7 = arith.maximumf %5, %6 : vector<8x256xf32>
    %c0_6 = arith.constant 0 : index
    %c0_7 = arith.constant 0 : index
    %8 = vector.load %arg4[%c0_6, %c0_7] : memref<256x128xf32, #tpu.memory_space<vmem>>, vector<256x128xf32>
    %cst_8 = arith.constant dense<0.000000e+00> : vector<8x128xf32>
    %9 = tpu.matmul %7, %8, %cst_8 {dimension_numbers = #tpu.dot_dimension_numbers<[1], [0], [0], [1], [0, 0, 1, 1], [], []>} : vector<8x256xf32>, vector<256x128xf32>, vector<8x128xf32> -> vector<8x128xf32>
    %c0_9 = arith.constant 0 : index
    %c0_10 = arith.constant 0 : index
    %10 = vector.load %arg5[%c0_9, %c0_10] : memref<1x128xf32, #tpu.memory_space<vmem>>, vector<1x128xf32>
    %11 = vector.broadcast %10 : vector<1x128xf32> to vector<8x128xf32>
    %12 = arith.addf %9, %11 : vector<8x128xf32>
    %c0_11 = arith.constant 0 : index
    %c0_12 = arith.constant 0 : index
    %13 = vector.load %arg6[%c0_11, %c0_12] : memref<8x128xf32, #tpu.memory_space<vmem>>, vector<8x128xf32>
    tpu.vector_store %arg6[%c0_11, %c0_12], %12 {strides = array<i32>} : memref<8x128xf32, #tpu.memory_space<vmem>>, vector<8x128xf32>,
    return
  }
  func.func @transform_0(%arg0: i32) -> (i32, i32) {
    %c0_i32 = arith.constant 0 : i32
    %c0_i32_0 = arith.constant 0 : i32
    return %arg0, %c0_i32 : i32, i32
  }
  func.func @transform_1(%arg0: i32) -> (i32, i32) {
    %c0_i32 = arith.constant 0 : i32
    %c0_i32_0 = arith.constant 0 : i32
    %c0_i32_1 = arith.constant 0 : i32
    return %c0_i32, %c0_i32_0 : i32, i32
  }
  func.func @transform_2(%arg0: i32) -> (i32, i32) {
    %c0_i32 = arith.constant 0 : i32
    %c0_i32_0 = arith.constant 0 : i32
    %c0_i32_1 = arith.constant 0 : i32
    return %c0_i32, %c0_i32_0 : i32, i32
  }
  func.func @transform_3(%arg0: i32) -> (i32, i32) {
    %c0_i32 = arith.constant 0 : i32
    %c0_i32_0 = arith.constant 0 : i32
    %c0_i32_1 = arith.constant 0 : i32
    return %c0_i32, %c0_i32_0 : i32, i32
  }
  func.func @transform_4(%arg0: i32) -> (i32, i32) {
    %c0_i32 = arith.constant 0 : i32
    %c0_i32_0 = arith.constant 0 : i32
    %c0_i32_1 = arith.constant 0 : i32
    return %c0_i32, %c0_i32_0 : i32, i32
  }
  func.func @transform_5(%arg0: i32) -> (i32, i32) {
    %c0_i32 = arith.constant 0 : i32
    %c0_i32_0 = arith.constant 0 : i32
    return %arg0, %c0_i32 : i32, i32
  }
}

</mosaic_0001>

<bundles_post_ra>
// kernel: tpu_custom_call.1
= control target key start
LH: loop header
LB: loop body
LE: loop exit
PB: predicated region body
PF: predicated region fallthrough
CT: control target
= control target key end

     0   :  { %10 = vsyncpa [#allocation3], 0  ;;  %s1274_s0 = inlined_call_operand.hbm [shape: f32[8,1024], index: 0, kind: input, shape index: {}]   ;;  %s1275_s1 = inlined_call_operand.hbm [shape: f32[1024,256], index: 1, kind: input, shape index: {}]   ;;  %s1276_s2 = inlined_call_operand.vmem [shape: f32[1,256], index: 2, kind: input, shape index: {}]   ;;  %s1277_s3 = inlined_call_operand.hbm [shape: f32[256,128], index: 3, kind: input, shape index: {}]   ;;  %s1278_s4 = inlined_call_operand.vmem [shape: f32[1,128], index: 4, kind: input, shape index: {}]   ;;  %s1279_s5 = inlined_call_operand.hbm [shape: f32[8,128], index: 5, kind: output, shape index: {}]  }
   0x1   :  { %11 = vsyncpa [#allocation6], 0 }
   0x2   :  { %12 = vsyncpa [#allocation4], 0  ;;  %s1182_s18 = smov [#allocation5]   ;;  %s1088_s22 = scalar_lea.hbm %s1275_s1, 32768 }
   0x3   :  { %s28_s19 = sshll.u32 %s1182_s18, 4  ;;  %p1089_p0 = scmp.ne.s32.totalorder %s1275_s1, %s1088_s22  ;;  %s29_s19 = int_to_ptr.vmem [resolvable:$true] %s28_s19 }
   0x4   :  { %p1092_p1 = scmp.lt.u32.totalorder %s1088_s22, %s1275_s1 }
   0x6   :  { %p1094_p2 = pnand %p1092_p1, %p1089_p0 }
   0x8   :  { %1097 = shalt.err (!%p1094_p2)
}
   0x9   :  { %s1098_s27 = scalar_lea.vmem %s29_s19, 32768  ;;  %p1103_p4 = scmp.lt.s32.totalorder %s29_s19, %s29_s19 }
   0xa   :  { %p1099_p3 = scmp.ne.s32.totalorder %s29_s19, %s1098_s27  ;;  %p1104_p5 = scmp.lt.s32.totalorder %s1098_s27, %s1098_s27 }
   0xc   :  { %p1105_p6 = por %p1104_p5, %p1103_p4 }
   0xe   :  { %p1106_p7 = pnand %p1105_p6, %p1099_p3 }
  0x10   :  { %1109 = shalt.err (!%p1106_p7)
}
  0x11   :  { %s1183_s28 = smov 256   ;;  %s1184_s29 = smov 16  }
  0x12   :  { %34 = dma.hbm_to_vmem [thread:$0]  %s1275_s1, 32768, %s29_s19, [#allocation6], %s1183_s28, %s1183_s28, %s1184_s29  }
  0x13   :  { %s1185_s7 = smov [#allocation2]   ;;  %s1186_s9 = smov [#allocation7]  }
  0x14   :  { %s19_s8 = sshll.u32 %s1185_s7, 4  ;;  %s42_s10 = sshll.u32 %s1186_s9, 4  ;;  %s20_s8 = int_to_ptr.vmem [resolvable:$true] %s19_s8  ;;  %s43_s10 = int_to_ptr.vmem [resolvable:$true] %s42_s10 }
  0x15   :  { %s1110_s13 = scalar_lea.hbm %s1274_s0, 1024 }
  0x16   :  { %p1111_p8 = scmp.ne.s32.totalorder %s1274_s0, %s1110_s13  ;;  %p1114_p9 = scmp.lt.u32.totalorder %s1110_s13, %s1274_s0 }
  0x18   :  { %p1116_p10 = pnand %p1114_p9, %p1111_p8 }
  0x1a   :  { %1119 = shalt.err (!%p1116_p10)
}
  0x1b   :  { %s1120_s1 = scalar_lea.vmem %s20_s8, 1024  ;;  %p1125_p12 = scmp.lt.s32.totalorder %s20_s8, %s20_s8 }
  0x1c   :  { %p1121_p11 = scmp.ne.s32.totalorder %s20_s8, %s1120_s1  ;;  %p1126_p13 = scmp.lt.s32.totalorder %s1120_s1, %s1120_s1 }
  0x1e   :  { %p1127_p0 = por %p1126_p13, %p1125_p12 }
  0x20   :  { %p1128_p1 = pnand %p1127_p0, %p1121_p11 }
  0x22   :  { %1131 = shalt.err (!%p1128_p1)
}
  0x23   :  { %22 = dma.hbm_to_vmem [thread:$0]  %s1274_s0, 1024, %s20_s8, [#allocation3]  }
  0x24   :  { %s1132_s22 = scalar_lea.hbm %s1277_s3, 4096 }
  0x25   :  { %p1133_p2 = scmp.ne.s32.totalorder %s1277_s3, %s1132_s22  ;;  %p1136_p3 = scmp.lt.u32.totalorder %s1132_s22, %s1277_s3 }
  0x27   :  { %p1138_p4 = pnand %p1136_p3, %p1133_p2 }
  0x29   :  { %1141 = shalt.err (!%p1138_p4)
}
  0x2a   :  { %s1142_s27 = scalar_lea.vmem %s43_s10, 4096  ;;  %p1147_p6 = scmp.lt.s32.totalorder %s43_s10, %s43_s10 }
  0x2b   :  { %p1143_p5 = scmp.ne.s32.totalorder %s43_s10, %s1142_s27  ;;  %p1148_p7 = scmp.lt.s32.totalorder %s1142_s27, %s1142_s27 }
  0x2d   :  { %p1149_p8 = por %p1148_p7, %p1147_p6 }
  0x2f   :  { %p1150_p9 = pnand %p1149_p8, %p1143_p5 }
  0x31   :  { %1153 = shalt.err (!%p1150_p9)
}
  0x32   :  { %s1187_s0 = smov 128   ;;  %s1188_s28 = smov 8  }
  0x33   :  { %48 = dma.hbm_to_vmem [thread:$0]  %s1277_s3, 4096, %s43_s10, [#allocation6], %s1187_s0, %s1187_s0, %s1188_s28  }
  0x34   :  { %1176 = dma.done.wait [#allocation3], 1024  }
  0x35   :  { %1177 = vsyncadd [#allocation3], 4294966272 }
  0x36   :  { %1178 = dma.done.wait [#allocation6], 36864  }
  0x37   :  { %1179 = vsyncadd [#allocation6], 4294930432  ;;  %v69_v0 = vld [vmem:[#allocation5 + $0x8] sm:$0xff]  ;;  %v71_v1 = vld [vmem:[#allocation5 + $0x18] sm:$0xff] }
  0x38   :  { %v197_v2 = vld [vmem:[#allocation5 + $0x408] sm:$0xff]  ;;  %v784_v3 = vpack.c.bf16 %v71_v1, %v69_v0  ;;  %v199_v4 = vld [vmem:[#allocation5 + $0x418] sm:$0xff]  ;;  %v68_v5 = vld [vmem:[#allocation5] sm:$0xff] }
  0x39   :  { %v70_v6 = vld [vmem:[#allocation5 + $0x10] sm:$0xff]  ;;  %v912_v7 = vpack.c.bf16 %v199_v4, %v197_v2  ;;  %v196_v9 = vld [vmem:[#allocation5 + $0x400] sm:$0xff]  ;;  %v73_v11 = vld [vmem:[#allocation5 + $0x28] sm:$0xff] }
  0x3a   :  { %v786_v8 = vpack.c.bf16 %v70_v6, %v68_v5  ;;  %v198_v10 = vld [vmem:[#allocation5 + $0x410] sm:$0xff]  ;;  %785 = vmatprep.subr.bf16.mxu1 %v784_v3  ;;  %v75_v13 = vld [vmem:[#allocation5 + $0x38] sm:$0xff]  ;;  %v201_v14 = vld [vmem:[#allocation5 + $0x428] sm:$0xff] }
  0x3b   :  { %v914_v12 = vpack.c.bf16 %v198_v10, %v196_v9  ;;  %v203_v15 = vld [vmem:[#allocation5 + $0x438] sm:$0xff]  ;;  %913 = vmatprep.subr.bf16.mxu0 %v912_v7  ;;  %v788_v16 = vpack.c.bf16 %v75_v13, %v73_v11  ;;  %v72_v18 = vld [vmem:[#allocation5 + $0x20] sm:$0xff]  ;;  %v74_v19 = vld [vmem:[#allocation5 + $0x30] sm:$0xff] }
  0x3c   :  { %787 = vmatpush1.bf16.msra.mxu1 %v786_v8  ;;  %v916_v17 = vpack.c.bf16 %v203_v15, %v201_v14  ;;  %v200_v20 = vld [vmem:[#allocation5 + $0x420] sm:$0xff]  ;;  %v790_v21 = vpack.c.bf16 %v74_v19, %v72_v18  ;;  %v202_v22 = vld [vmem:[#allocation5 + $0x430] sm:$0xff]  ;;  %v77_v23 = vld [vmem:[#allocation5 + $0x48] sm:$0xff] }
  0x3d   :  { %915 = vmatpush1.bf16.msra.mxu0 %v914_v12  ;;  %v79_v24 = vld [vmem:[#allocation5 + $0x58] sm:$0xff]  ;;  %789 = vmatprep.subr.bf16.mxu1 %v788_v16  ;;  %v918_v25 = vpack.c.bf16 %v202_v22, %v200_v20  ;;  %v205_v27 = vld [vmem:[#allocation5 + $0x448] sm:$0xff]  ;;  %v76_v29 = vld [vmem:[#allocation5 + $0x40] sm:$0xff] }
  0x3e   :  { %917 = vmatprep.subr.bf16.mxu0 %v916_v17  ;;  %v792_v26 = vpack.c.bf16 %v79_v24, %v77_v23  ;;  %v207_v28 = vld [vmem:[#allocation5 + $0x458] sm:$0xff]  ;;  %v78_v31 = vld [vmem:[#allocation5 + $0x50] sm:$0xff]  ;;  %v204_v32 = vld [vmem:[#allocation5 + $0x440] sm:$0xff] }
  0x3f   :  { %v920_v30 = vpack.c.bf16 %v207_v28, %v205_v27  ;;  %v206_v33 = vld [vmem:[#allocation5 + $0x450] sm:$0xff]  ;;  %v794_v34 = vpack.c.bf16 %v78_v31, %v76_v29  ;;  %v81_v35 = vld [vmem:[#allocation5 + $0x68] sm:$0xff]  ;;  %v83_v36 = vld [vmem:[#allocation5 + $0x78] sm:$0xff] }
  0x40   :  { %791 = vmatpush1.bf16.msra.mxu1 %v790_v21  ;;  %v209_v37 = vld [vmem:[#allocation5 + $0x468] sm:$0xff]  ;;  %v922_v38 = vpack.c.bf16 %v206_v33, %v204_v32  ;;  %v796_v39 = vpack.c.bf16 %v83_v36, %v81_v35  ;;  %v211_v40 = vld [vmem:[#allocation5 + $0x478] sm:$0xff]  ;;  %v80_v41 = vld [vmem:[#allocation5 + $0x60] sm:$0xff] }
  0x41   :  { %919 = vmatpush1.bf16.msra.mxu0 %v918_v25  ;;  %793 = vmatprep.subr.bf16.mxu1 %v792_v26  ;;  %v82_v42 = vld [vmem:[#allocation5 + $0x70] sm:$0xff]  ;;  %v924_v43 = vpack.c.bf16 %v211_v40, %v209_v37  ;;  %v208_v44 = vld [vmem:[#allocation5 + $0x460] sm:$0xff]  ;;  %v85_v46 = vld [vmem:[#allocation5 + $0x88] sm:$0xff] }
  0x42   :  { %921 = vmatprep.subr.bf16.mxu0 %v920_v30  ;;  %v210_v45 = vld [vmem:[#allocation5 + $0x470] sm:$0xff]  ;;  %v87_v47 = vld [vmem:[#allocation5 + $0x98] sm:$0xff]  ;;  %v213_v48 = vld [vmem:[#allocation5 + $0x488] sm:$0xff]  ;;  %v798_v50 = vpack.c.bf16 %v82_v42, %v80_v41 }
  0x43   :  { %v215_v49 = vld [vmem:[#allocation5 + $0x498] sm:$0xff]  ;;  %v926_v51 = vpack.c.bf16 %v210_v45, %v208_v44  ;;  %v800_v52 = vpack.c.bf16 %v87_v47, %v85_v46  ;;  %v84_v53 = vld [vmem:[#allocation5 + $0x80] sm:$0xff]  ;;  %v86_v54 = vld [vmem:[#allocation5 + $0x90] sm:$0xff] }
  0x44   :  { %795 = vmatpush1.bf16.msra.mxu1 %v794_v34  ;;  %v212_v55 = vld [vmem:[#allocation5 + $0x480] sm:$0xff]  ;;  %v928_v56 = vpack.c.bf16 %v215_v49, %v213_v48  ;;  %v214_v57 = vld [vmem:[#allocation5 + $0x490] sm:$0xff]  ;;  %v89_v58 = vld [vmem:[#allocation5 + $0xa8] sm:$0xff]  ;;  %v802_v62 = vpack.c.bf16 %v86_v54, %v84_v53 }
  0x45   :  { %923 = vmatpush1.bf16.msra.mxu0 %v922_v38  ;;  %797 = vmatprep.subr.bf16.mxu1 %v796_v39  ;;  %v91_v59 = vld [vmem:[#allocation5 + $0xb8] sm:$0xff]  ;;  %v217_v60 = vld [vmem:[#allocation5 + $0x4a8] sm:$0xff]  ;;  %v930_v63 = vpack.c.bf16 %v214_v57, %v212_v55  ;;  %v88_v1 = vld [vmem:[#allocation5 + $0xa0] sm:$0xff] }
  0x46   :  { %925 = vmatprep.subr.bf16.mxu0 %v924_v43  ;;  %v219_v61 = vld [vmem:[#allocation5 + $0x4b8] sm:$0xff]  ;;  %v804_v0 = vpack.c.bf16 %v91_v59, %v89_v58  ;;  %v90_v2 = vld [vmem:[#allocation5 + $0xb0] sm:$0xff]  ;;  %v216_v3 = vld [vmem:[#allocation5 + $0x4a0] sm:$0xff] }
  0x47   :  { %v932_v4 = vpack.c.bf16 %v219_v61, %v217_v60  ;;  %v218_v5 = vld [vmem:[#allocation5 + $0x4b0] sm:$0xff]  ;;  %v93_v6 = vld [vmem:[#allocation5 + $0xc8] sm:$0xff]  ;;  %v95_v7 = vld [vmem:[#allocation5 + $0xd8] sm:$0xff]  ;;  %v806_v10 = vpack.c.bf16 %v90_v2, %v88_v1 }
  0x48   :  { %799 = vmatpush1.bf16.msra.mxu1 %v798_v50  ;;  %v221_v8 = vld [vmem:[#allocation5 + $0x4c8] sm:$0xff]  ;;  %v223_v9 = vld [vmem:[#allocation5 + $0x4d8] sm:$0xff]  ;;  %v934_v11 = vpack.c.bf16 %v218_v5, %v216_v3  ;;  %v808_v12 = vpack.c.bf16 %v95_v7, %v93_v6  ;;  %v92_v13 = vld [vmem:[#allocation5 + $0xc0] sm:$0xff] }
  0x49   :  { %927 = vmatpush1.bf16.msra.mxu0 %v926_v51  ;;  %801 = vmatprep.subr.bf16.mxu1 %v800_v52  ;;  %v94_v14 = vld [vmem:[#allocation5 + $0xd0] sm:$0xff]  ;;  %v220_v15 = vld [vmem:[#allocation5 + $0x4c0] sm:$0xff]  ;;  %v936_v16 = vpack.c.bf16 %v223_v9, %v221_v8  ;;  %v97_v18 = vld [vmem:[#allocation5 + $0xe8] sm:$0xff] }
  0x4a   :  { %929 = vmatprep.subr.bf16.mxu0 %v928_v56  ;;  %v222_v17 = vld [vmem:[#allocation5 + $0x4d0] sm:$0xff]  ;;  %v99_v19 = vld [vmem:[#allocation5 + $0xf8] sm:$0xff]  ;;  %v225_v20 = vld [vmem:[#allocation5 + $0x4e8] sm:$0xff]  ;;  %v810_v22 = vpack.c.bf16 %v94_v14, %v92_v13 }
  0x4b   :  { %v227_v21 = vld [vmem:[#allocation5 + $0x4f8] sm:$0xff]  ;;  %v938_v23 = vpack.c.bf16 %v222_v17, %v220_v15  ;;  %v812_v24 = vpack.c.bf16 %v99_v19, %v97_v18  ;;  %v96_v25 = vld [vmem:[#allocation5 + $0xe0] sm:$0xff]  ;;  %v98_v26 = vld [vmem:[#allocation5 + $0xf0] sm:$0xff] }
  0x4c   :  { %803 = vmatpush1.bf16.msra.mxu1 %v802_v62  ;;  %v224_v27 = vld [vmem:[#allocation5 + $0x4e0] sm:$0xff]  ;;  %v940_v28 = vpack.c.bf16 %v227_v21, %v225_v20  ;;  %v226_v29 = vld [vmem:[#allocation5 + $0x4f0] sm:$0xff]  ;;  %v101_v30 = vld [vmem:[#allocation5 + $0x108] sm:$0xff]  ;;  %v814_v34 = vpack.c.bf16 %v98_v26, %v96_v25 }
  0x4d   :  { %931 = vmatpush1.bf16.msra.mxu0 %v930_v63  ;;  %805 = vmatprep.subr.bf16.mxu1 %v804_v0  ;;  %v103_v31 = vld [vmem:[#allocation5 + $0x118] sm:$0xff]  ;;  %v229_v32 = vld [vmem:[#allocation5 + $0x508] sm:$0xff]  ;;  %v942_v35 = vpack.c.bf16 %v226_v29, %v224_v27  ;;  %v100_v37 = vld [vmem:[#allocation5 + $0x100] sm:$0xff] }
  0x4e   :  { %933 = vmatprep.subr.bf16.mxu0 %v932_v4  ;;  %v231_v33 = vld [vmem:[#allocation5 + $0x518] sm:$0xff]  ;;  %v816_v36 = vpack.c.bf16 %v103_v31, %v101_v30  ;;  %v102_v38 = vld [vmem:[#allocation5 + $0x110] sm:$0xff]  ;;  %v228_v39 = vld [vmem:[#allocation5 + $0x500] sm:$0xff] }
  0x4f   :  { %v944_v40 = vpack.c.bf16 %v231_v33, %v229_v32  ;;  %v230_v41 = vld [vmem:[#allocation5 + $0x510] sm:$0xff]  ;;  %v105_v42 = vld [vmem:[#allocation5 + $0x128] sm:$0xff]  ;;  %v107_v43 = vld [vmem:[#allocation5 + $0x138] sm:$0xff]  ;;  %v818_v46 = vpack.c.bf16 %v102_v38, %v100_v37 }
  0x50   :  { %807 = vmatpush1.bf16.msra.mxu1 %v806_v10  ;;  %v233_v44 = vld [vmem:[#allocation5 + $0x528] sm:$0xff]  ;;  %v235_v45 = vld [vmem:[#allocation5 + $0x538] sm:$0xff]  ;;  %v946_v47 = vpack.c.bf16 %v230_v41, %v228_v39  ;;  %v820_v48 = vpack.c.bf16 %v107_v43, %v105_v42  ;;  %v104_v49 = vld [vmem:[#allocation5 + $0x120] sm:$0xff] }
  0x51   :  { %935 = vmatpush1.bf16.msra.mxu0 %v934_v11  ;;  %809 = vmatprep.subr.bf16.mxu1 %v808_v12  ;;  %v106_v50 = vld [vmem:[#allocation5 + $0x130] sm:$0xff]  ;;  %v232_v51 = vld [vmem:[#allocation5 + $0x520] sm:$0xff]  ;;  %v948_v52 = vpack.c.bf16 %v235_v45, %v233_v44  ;;  %v109_v54 = vld [vmem:[#allocation5 + $0x148] sm:$0xff] }
  0x52   :  { %937 = vmatprep.subr.bf16.mxu0 %v936_v16  ;;  %v234_v53 = vld [vmem:[#allocation5 + $0x530] sm:$0xff]  ;;  %v111_v55 = vld [vmem:[#allocation5 + $0x158] sm:$0xff]  ;;  %v237_v56 = vld [vmem:[#allocation5 + $0x548] sm:$0xff]  ;;  %v822_v58 = vpack.c.bf16 %v106_v50, %v104_v49 }
  0x53   :  { %v239_v57 = vld [vmem:[#allocation5 + $0x558] sm:$0xff]  ;;  %v950_v59 = vpack.c.bf16 %v234_v53, %v232_v51  ;;  %v824_v60 = vpack.c.bf16 %v111_v55, %v109_v54  ;;  %v108_v61 = vld [vmem:[#allocation5 + $0x140] sm:$0xff]  ;;  %v110_v62 = vld [vmem:[#allocation5 + $0x150] sm:$0xff] }
  0x54   :  { %811 = vmatpush1.bf16.msra.mxu1 %v810_v22  ;;  %v236_v63 = vld [vmem:[#allocation5 + $0x540] sm:$0xff]  ;;  %v952_v0 = vpack.c.bf16 %v239_v57, %v237_v56  ;;  %v238_v1 = vld [vmem:[#allocation5 + $0x550] sm:$0xff]  ;;  %v113_v2 = vld [vmem:[#allocation5 + $0x168] sm:$0xff]  ;;  %v826_v6 = vpack.c.bf16 %v110_v62, %v108_v61 }
  0x55   :  { %939 = vmatpush1.bf16.msra.mxu0 %v938_v23  ;;  %813 = vmatprep.subr.bf16.mxu1 %v812_v24  ;;  %v115_v3 = vld [vmem:[#allocation5 + $0x178] sm:$0xff]  ;;  %v241_v4 = vld [vmem:[#allocation5 + $0x568] sm:$0xff]  ;;  %v112_v7 = vld [vmem:[#allocation5 + $0x160] sm:$0xff]  ;;  %v954_v8 = vpack.c.bf16 %v238_v1, %v236_v63 }
  0x56   :  { %941 = vmatprep.subr.bf16.mxu0 %v940_v28  ;;  %v243_v5 = vld [vmem:[#allocation5 + $0x578] sm:$0xff]  ;;  %v828_v9 = vpack.c.bf16 %v115_v3, %v113_v2  ;;  %v114_v10 = vld [vmem:[#allocation5 + $0x170] sm:$0xff]  ;;  %v240_v11 = vld [vmem:[#allocation5 + $0x560] sm:$0xff] }
  0x57   :  { %v242_v12 = vld [vmem:[#allocation5 + $0x570] sm:$0xff]  ;;  %v956_v13 = vpack.c.bf16 %v243_v5, %v241_v4  ;;  %v117_v14 = vld [vmem:[#allocation5 + $0x188] sm:$0xff]  ;;  %v119_v15 = vld [vmem:[#allocation5 + $0x198] sm:$0xff]  ;;  %v830_v20 = vpack.c.bf16 %v114_v10, %v112_v7 }
  0x58   :  { %815 = vmatpush1.bf16.msra.mxu1 %v814_v34  ;;  %v61_v16 = vld [vmem:[#allocation2 + $0x8] sm:$0xff]  ;;  %v247_v18 = vld [vmem:[#allocation5 + $0x598] sm:$0xff]  ;;  %v958_v21 = vpack.c.bf16 %v242_v12, %v240_v11  ;;  %v832_v22 = vpack.c.bf16 %v119_v15, %v117_v14  ;;  %v116_v23 = vld [vmem:[#allocation5 + $0x180] sm:$0xff] }
  0x59   :  { %943 = vmatpush1.bf16.msra.mxu0 %v942_v35  ;;  %817 = vmatprep.subr.bf16.mxu1 %v816_v36  ;;  %v245_v17 = vld [vmem:[#allocation5 + $0x588] sm:$0xff]  ;;  %v118_v24 = vld [vmem:[#allocation5 + $0x190] sm:$0xff]  ;;  %v244_v25 = vld [vmem:[#allocation5 + $0x580] sm:$0xff] }
  0x5a   :  { %945 = vmatprep.subr.bf16.mxu0 %v944_v40  ;;  %400 = vmatprep.mubr.f32.mxu1 %v61_v16  ;;  %v65_v19 = vld [vmem:[#allocation2 + $0x28] sm:$0xff]  ;;  %v960_v26 = vpack.c.bf16 %v247_v18, %v245_v17  ;;  %v246_v27 = vld [vmem:[#allocation5 + $0x590] sm:$0xff]  ;;  %v123_v29 = vld [vmem:[#allocation5 + $0x1b8] sm:$0xff]  ;;  %v834_v32 = vpack.c.bf16 %v118_v24, %v116_v23 }
  0x5b   :  { %542 = vmatprep.mubr.f32.mxu0 %v65_v19  ;;  %v121_v28 = vld [vmem:[#allocation5 + $0x1a8] sm:$0xff]  ;;  %v251_v31 = vld [vmem:[#allocation5 + $0x5b8] sm:$0xff]  ;;  %v962_v33 = vpack.c.bf16 %v246_v27, %v244_v25  ;;  %v120_v35 = vld [vmem:[#allocation5 + $0x1a0] sm:$0xff] }
  0x5c   :  { %819 = vmatpush1.bf16.msra.mxu1 %v818_v46  ;;  %v249_v30 = vld [vmem:[#allocation5 + $0x5a8] sm:$0xff]  ;;  %v836_v34 = vpack.c.bf16 %v123_v29, %v121_v28  ;;  %v122_v36 = vld [vmem:[#allocation5 + $0x1b0] sm:$0xff]  ;;  %v248_v37 = vld [vmem:[#allocation5 + $0x5a0] sm:$0xff] }
  0x5d   :  { %947 = vmatpush1.bf16.msra.mxu0 %v946_v47  ;;  %821 = vmatprep.subr.bf16.mxu1 %v820_v48  ;;  %v964_v38 = vpack.c.bf16 %v251_v31, %v249_v30  ;;  %v250_v39 = vld [vmem:[#allocation5 + $0x5b0] sm:$0xff]  ;;  %v125_v40 = vld [vmem:[#allocation5 + $0x1c8] sm:$0xff]  ;;  %v127_v41 = vld [vmem:[#allocation5 + $0x1d8] sm:$0xff]  ;;  %v838_v44 = vpack.c.bf16 %v122_v36, %v120_v35 }
  0x5e   :  { %949 = vmatprep.subr.bf16.mxu0 %v948_v52  ;;  %v253_v42 = vld [vmem:[#allocation5 + $0x5c8] sm:$0xff]  ;;  %v255_v43 = vld [vmem:[#allocation5 + $0x5d8] sm:$0xff]  ;;  %v966_v45 = vpack.c.bf16 %v250_v39, %v248_v37  ;;  %v840_v46 = vpack.c.bf16 %v127_v41, %v125_v40  ;;  %v124_v47 = vld [vmem:[#allocation5 + $0x1c0] sm:$0xff] }
  0x5f   :  { %v126_v48 = vld [vmem:[#allocation5 + $0x1d0] sm:$0xff]  ;;  %v252_v49 = vld [vmem:[#allocation5 + $0x5c0] sm:$0xff]  ;;  %v968_v50 = vpack.c.bf16 %v255_v43, %v253_v42  ;;  %v129_v52 = vld [vmem:[#allocation5 + $0x1e8] sm:$0xff] }
  0x60   :  { %823 = vmatpush1.bf16.msra.mxu1 %v822_v58  ;;  %v254_v51 = vld [vmem:[#allocation5 + $0x5d0] sm:$0xff]  ;;  %v131_v53 = vld [vmem:[#allocation5 + $0x1f8] sm:$0xff]  ;;  %v257_v54 = vld [vmem:[#allocation5 + $0x5e8] sm:$0xff]  ;;  %v842_v56 = vpack.c.bf16 %v126_v48, %v124_v47 }
  0x61   :  { %951 = vmatpush1.bf16.msra.mxu0 %v950_v59  ;;  %825 = vmatprep.subr.bf16.mxu1 %v824_v60  ;;  %v259_v55 = vld [vmem:[#allocation5 + $0x5f8] sm:$0xff]  ;;  %v970_v57 = vpack.c.bf16 %v254_v51, %v252_v49  ;;  %v844_v58 = vpack.c.bf16 %v131_v53, %v129_v52  ;;  %v128_v59 = vld [vmem:[#allocation5 + $0x1e0] sm:$0xff]  ;;  %v130_v60 = vld [vmem:[#allocation5 + $0x1f0] sm:$0xff] }
  0x62   :  { %953 = vmatprep.subr.bf16.mxu0 %v952_v0  ;;  %v256_v61 = vld [vmem:[#allocation5 + $0x5e0] sm:$0xff]  ;;  %v972_v62 = vpack.c.bf16 %v259_v55, %v257_v54  ;;  %v258_v63 = vld [vmem:[#allocation5 + $0x5f0] sm:$0xff]  ;;  %v133_v0 = vld [vmem:[#allocation5 + $0x208] sm:$0xff]  ;;  %v846_v4 = vpack.c.bf16 %v130_v60, %v128_v59 }
  0x63   :  { %v135_v1 = vld [vmem:[#allocation5 + $0x218] sm:$0xff]  ;;  %v261_v2 = vld [vmem:[#allocation5 + $0x608] sm:$0xff]  ;;  %v974_v5 = vpack.c.bf16 %v258_v63, %v256_v61  ;;  %v132_v7 = vld [vmem:[#allocation5 + $0x200] sm:$0xff] }
  0x64   :  { %827 = vmatpush1.bf16.msra.mxu1 %v826_v6  ;;  %v263_v3 = vld [vmem:[#allocation5 + $0x618] sm:$0xff]  ;;  %v848_v6 = vpack.c.bf16 %v135_v1, %v133_v0  ;;  %v262_v11 = vld [vmem:[#allocation5 + $0x610] sm:$0xff]  ;;  %v137_v12 = vld [vmem:[#allocation5 + $0x228] sm:$0xff] }
  0x65   :  { %955 = vmatpush1.bf16.msra.mxu0 %v954_v8  ;;  %829 = vmatprep.subr.bf16.mxu1 %v828_v9  ;;  %v134_v8 = vld [vmem:[#allocation5 + $0x210] sm:$0xff]  ;;  %v260_v9 = vld [vmem:[#allocation5 + $0x600] sm:$0xff]  ;;  %v976_v10 = vpack.c.bf16 %v263_v3, %v261_v2  ;;  %v265_v14 = vld [vmem:[#allocation5 + $0x628] sm:$0xff] }
  0x66   :  { %957 = vmatprep.subr.bf16.mxu0 %v956_v13  ;;  %v139_v13 = vld [vmem:[#allocation5 + $0x238] sm:$0xff]  ;;  %v60_v16 = vld [vmem:[#allocation2] sm:$0xff]  ;;  %v850_v17 = vpack.c.bf16 %v134_v8, %v132_v7  ;;  %v978_v19 = vpack.c.bf16 %v262_v11, %v260_v9  ;;  %v266_v25 = vld [vmem:[#allocation5 + $0x630] sm:$0xff] }
  0x67   :  { %v267_v15 = vld [vmem:[#allocation5 + $0x638] sm:$0xff]  ;;  %v64_v18 = vld [vmem:[#allocation2 + $0x20] sm:$0xff]  ;;  %v269_v28 = vld [vmem:[#allocation5 + $0x648] sm:$0xff] }
  0x68   :  { %831 = vmatpush1.bf16.msra.mxu1 %v830_v20  ;;  %v852_v20 = vpack.c.bf16 %v139_v13, %v137_v12  ;;  %v264_v23 = vld [vmem:[#allocation5 + $0x620] sm:$0xff]  ;;  %v980_v24 = vpack.c.bf16 %v267_v15, %v265_v14  ;;  %v143_v27 = vld [vmem:[#allocation5 + $0x258] sm:$0xff]  ;;  %v270_v37 = vld [vmem:[#allocation5 + $0x650] sm:$0xff] }
  0x69   :  { %959 = vmatpush1.bf16.msra.mxu0 %v958_v21  ;;  %833 = vmatprep.subr.bf16.mxu1 %v832_v22  ;;  %v136_v21 = vld [vmem:[#allocation5 + $0x220] sm:$0xff]  ;;  %v138_v22 = vld [vmem:[#allocation5 + $0x230] sm:$0xff]  ;;  %v271_v29 = vld [vmem:[#allocation5 + $0x658] sm:$0xff]  ;;  %v982_v31 = vpack.c.bf16 %v266_v25, %v264_v23 }
  0x6a   :  { %961 = vmatprep.subr.bf16.mxu0 %v960_v26  ;;  %v141_v26 = vld [vmem:[#allocation5 + $0x248] sm:$0xff]  ;;  %v854_v30 = vpack.c.bf16 %v138_v22, %v136_v21  ;;  %v268_v35 = vld [vmem:[#allocation5 + $0x640] sm:$0xff]  ;;  %v984_v36 = vpack.c.bf16 %v271_v29, %v269_v28  ;;  %v147_v39 = vld [vmem:[#allocation5 + $0x278] sm:$0xff] }
  0x6b   :  { %v273_v40 = vld [vmem:[#allocation5 + $0x668] sm:$0xff]  ;;  %v275_v41 = vld [vmem:[#allocation5 + $0x678] sm:$0xff]  ;;  %v986_v43 = vpack.c.bf16 %v270_v37, %v268_v35  ;;  %v272_v47 = vld [vmem:[#allocation5 + $0x660] sm:$0xff] }
  0x6c   :  { %835 = vmatpush1.bf16.msra.mxu1 %v834_v32  ;;  %v856_v32 = vpack.c.bf16 %v143_v27, %v141_v26  ;;  %v988_v48 = vpack.c.bf16 %v275_v41, %v273_v40  ;;  %v274_v49 = vld [vmem:[#allocation5 + $0x670] sm:$0xff]  ;;  %v151_v51 = vld [vmem:[#allocation5 + $0x298] sm:$0xff]  ;;  %v277_v52 = vld [vmem:[#allocation5 + $0x688] sm:$0xff] }
  0x6d   :  { %963 = vmatpush1.bf16.msra.mxu0 %v962_v33  ;;  %837 = vmatprep.subr.bf16.mxu1 %v836_v34  ;;  %v140_v33 = vld [vmem:[#allocation5 + $0x240] sm:$0xff]  ;;  %v142_v34 = vld [vmem:[#allocation5 + $0x250] sm:$0xff]  ;;  %v279_v53 = vld [vmem:[#allocation5 + $0x698] sm:$0xff]  ;;  %v990_v55 = vpack.c.bf16 %v274_v49, %v272_v47 }
  0x6e   :  { %965 = vmatprep.subr.bf16.mxu0 %v964_v38  ;;  %v145_v38 = vld [vmem:[#allocation5 + $0x268] sm:$0xff]  ;;  %v858_v42 = vpack.c.bf16 %v142_v34, %v140_v33  ;;  %v276_v59 = vld [vmem:[#allocation5 + $0x680] sm:$0xff]  ;;  %v992_v60 = vpack.c.bf16 %v279_v53, %v277_v52  ;;  %v278_v61 = vld [vmem:[#allocation5 + $0x690] sm:$0xff] }
  0x6f   :  { %v155_v63 = vld [vmem:[#allocation5 + $0x2b8] sm:$0xff]  ;;  %v281_v0 = vld [vmem:[#allocation5 + $0x6a8] sm:$0xff]  ;;  %v994_v3 = vpack.c.bf16 %v278_v61, %v276_v59  ;;  %v280_v7 = vld [vmem:[#allocation5 + $0x6a0] sm:$0xff] }
  0x70   :  { %839 = vmatpush1.bf16.msra.mxu1 %v838_v44  ;;  %v860_v44 = vpack.c.bf16 %v147_v39, %v145_v38  ;;  %v283_v1 = vld [vmem:[#allocation5 + $0x6b8] sm:$0xff]  ;;  %v282_v9 = vld [vmem:[#allocation5 + $0x6b0] sm:$0xff]  ;;  %v285_v12 = vld [vmem:[#allocation5 + $0x6c8] sm:$0xff] }
  0x71   :  { %967 = vmatpush1.bf16.msra.mxu0 %v966_v45  ;;  %841 = vmatprep.subr.bf16.mxu1 %v840_v46  ;;  %v144_v45 = vld [vmem:[#allocation5 + $0x260] sm:$0xff]  ;;  %v146_v46 = vld [vmem:[#allocation5 + $0x270] sm:$0xff]  ;;  %v996_v8 = vpack.c.bf16 %v283_v1, %v281_v0  ;;  %v159_v11 = vld [vmem:[#allocation5 + $0x2d8] sm:$0xff] }
  0x72   :  { %969 = vmatprep.subr.bf16.mxu0 %v968_v50  ;;  %v149_v50 = vld [vmem:[#allocation5 + $0x288] sm:$0xff]  ;;  %v862_v54 = vpack.c.bf16 %v146_v46, %v144_v45  ;;  %v287_v13 = vld [vmem:[#allocation5 + $0x6d8] sm:$0xff]  ;;  %v156_v15 = vld [vmem:[#allocation5 + $0x2c0] sm:$0xff] }
  0x73   :  { %v1000_v21 = vpack.c.bf16 %v287_v13, %v285_v12  ;;  %v161_v22 = vld [vmem:[#allocation5 + $0x2e8] sm:$0xff]  ;;  %v163_v23 = vld [vmem:[#allocation5 + $0x2f8] sm:$0xff]  ;;  %v288_v33 = vld [vmem:[#allocation5 + $0x6e0] sm:$0xff] }
  0x74   :  { %843 = vmatpush1.bf16.msra.mxu1 %v842_v56  ;;  %v864_v56 = vpack.c.bf16 %v151_v51, %v149_v50  ;;  %v289_v25 = vld [vmem:[#allocation5 + $0x6e8] sm:$0xff]  ;;  %v291_v26 = vld [vmem:[#allocation5 + $0x6f8] sm:$0xff]  ;;  %v290_v35 = vld [vmem:[#allocation5 + $0x6f0] sm:$0xff] }
  0x75   :  { %971 = vmatpush1.bf16.msra.mxu0 %v970_v57  ;;  %845 = vmatprep.subr.bf16.mxu1 %v844_v58  ;;  %v148_v57 = vld [vmem:[#allocation5 + $0x280] sm:$0xff]  ;;  %v150_v58 = vld [vmem:[#allocation5 + $0x290] sm:$0xff]  ;;  %v67_v27 = vld [vmem:[#allocation2 + $0x38] sm:$0xff]  ;;  %v1004_v34 = vpack.c.bf16 %v291_v26, %v289_v25  ;;  %v1006_v41 = vpack.c.bf16 %v290_v35, %v288_v33 }
  0x76   :  { %973 = vmatprep.subr.bf16.mxu0 %v972_v62  ;;  %v153_v62 = vld [vmem:[#allocation5 + $0x2a8] sm:$0xff]  ;;  %v866_v2 = vpack.c.bf16 %v150_v58, %v148_v57  ;;  %v167_v37 = vld [vmem:[#allocation5 + $0x318] sm:$0xff]  ;;  %v292_v45 = vld [vmem:[#allocation5 + $0x700] sm:$0xff] }
  0x77   :  { %v293_v38 = vld [vmem:[#allocation5 + $0x708] sm:$0xff]  ;;  %v295_v39 = vld [vmem:[#allocation5 + $0x718] sm:$0xff]  ;;  %v294_v47 = vld [vmem:[#allocation5 + $0x710] sm:$0xff] }
  0x78   :  { %847 = vmatpush1.bf16.msra.mxu1 %v846_v4  ;;  %v868_v4 = vpack.c.bf16 %v155_v63, %v153_v62  ;;  %v1008_v46 = vpack.c.bf16 %v295_v39, %v293_v38  ;;  %v171_v49 = vld [vmem:[#allocation5 + $0x338] sm:$0xff]  ;;  %v297_v50 = vld [vmem:[#allocation5 + $0x728] sm:$0xff]  ;;  %v1010_v53 = vpack.c.bf16 %v294_v47, %v292_v45  ;;  %v296_v57 = vld [vmem:[#allocation5 + $0x720] sm:$0xff] }
  0x79   :  { %975 = vmatpush1.bf16.msra.mxu0 %v974_v5  ;;  %849 = vmatprep.subr.bf16.mxu1 %v848_v6  ;;  %v152_v5 = vld [vmem:[#allocation5 + $0x2a0] sm:$0xff]  ;;  %v154_v6 = vld [vmem:[#allocation5 + $0x2b0] sm:$0xff]  ;;  %v299_v51 = vld [vmem:[#allocation5 + $0x738] sm:$0xff] }
  0x7a   :  { %977 = vmatprep.subr.bf16.mxu0 %v976_v10  ;;  %v157_v10 = vld [vmem:[#allocation5 + $0x2c8] sm:$0xff]  ;;  %v870_v14 = vpack.c.bf16 %v154_v6, %v152_v5  ;;  %v1012_v58 = vpack.c.bf16 %v299_v51, %v297_v50  ;;  %v298_v59 = vld [vmem:[#allocation5 + $0x730] sm:$0xff]  ;;  %v175_v61 = vld [vmem:[#allocation5 + $0x358] sm:$0xff] }
  0x7b   :  { %401 = vmatmul.mubr.f32.vlgmr.msra.gmra.mrb[0].mxu1 %v60_v16  ;;  %v998_v16 = vpack.c.bf16 %v282_v9, %v280_v7  ;;  %v301_v62 = vld [vmem:[#allocation5 + $0x748] sm:$0xff]  ;;  %v303_v63 = vld [vmem:[#allocation5 + $0x758] sm:$0xff]  ;;  %v1014_v1 = vpack.c.bf16 %v298_v59, %v296_v57  ;;  %v300_v5 = vld [vmem:[#allocation5 + $0x740] sm:$0xff] }
  0x7c   :  { %851 = vmatpush1.bf16.msra.mxu1 %v850_v17  ;;  %543 = vmatmul.mubr.f32.vlgmr.msra.gmra.mrb[0].mxu0 %v64_v18  ;;  %v872_v17 = vpack.c.bf16 %v159_v11, %v157_v10  ;;  %v158_v18 = vld [vmem:[#allocation5 + $0x2d0] sm:$0xff]  ;;  %v1016_v6 = vpack.c.bf16 %v303_v63, %v301_v62  ;;  %v179_v9 = vld [vmem:[#allocation5 + $0x378] sm:$0xff]  ;;  %v305_v10 = vld [vmem:[#allocation5 + $0x768] sm:$0xff] }
  0x7d   :  { %979 = vmatpush1.bf16.msra.mxu0 %v978_v19  ;;  %853 = vmatprep.subr.bf16.mxu1 %v852_v20  ;;  %v284_v19 = vld [vmem:[#allocation5 + $0x6c0] sm:$0xff]  ;;  %v286_v20 = vld [vmem:[#allocation5 + $0x6d0] sm:$0xff]  ;;  %v874_v28 = vpack.c.bf16 %v158_v18, %v156_v15  ;;  %v307_v11 = vld [vmem:[#allocation5 + $0x778] sm:$0xff] }
  0x7e   :  { %981 = vmatprep.subr.bf16.mxu0 %v980_v24  ;;  %v63_v24 = vld [vmem:[#allocation2 + $0x18] sm:$0xff]  ;;  %613 = vmatprep.mubr.f32.mxu0 %v67_v27  ;;  %v1002_v29 = vpack.c.bf16 %v286_v20, %v284_v19  ;;  %v302_v7 = vld [vmem:[#allocation5 + $0x750] sm:$0xff]  ;;  %v176_v15 = vld [vmem:[#allocation5 + $0x360] sm:$0xff]  ;;  %v1020_v18 = vpack.c.bf16 %v307_v11, %v305_v10 }
  0x7f   :  { %471 = vmatprep.mubr.f32.mxu1 %v63_v24  ;;  %v1018_v13 = vpack.c.bf16 %v302_v7, %v300_v5  ;;  %v306_v19 = vld [vmem:[#allocation5 + $0x770] sm:$0xff]  ;;  %v181_v20 = vld [vmem:[#allocation5 + $0x388] sm:$0xff]  ;;  %v180_v27 = vld [vmem:[#allocation5 + $0x380] sm:$0xff] }
  0x80   :  { %855 = vmatpush1.bf16.msra.mxu1 %v854_v30  ;;  %v876_v30 = vpack.c.bf16 %v163_v23, %v161_v22  ;;  %v309_v22 = vld [vmem:[#allocation5 + $0x788] sm:$0xff]  ;;  %v311_v23 = vld [vmem:[#allocation5 + $0x798] sm:$0xff]  ;;  %v184_v39 = vld [vmem:[#allocation5 + $0x3a0] sm:$0xff] }
  0x81   :  { %983 = vmatpush1.bf16.msra.mxu0 %v982_v31  ;;  %857 = vmatprep.subr.bf16.mxu1 %v856_v32  ;;  %v160_v31 = vld [vmem:[#allocation5 + $0x2e0] sm:$0xff]  ;;  %v162_v32 = vld [vmem:[#allocation5 + $0x2f0] sm:$0xff]  ;;  %v187_v33 = vld [vmem:[#allocation5 + $0x3b8] sm:$0xff] }
  0x82   :  { %985 = vmatprep.subr.bf16.mxu0 %v984_v36  ;;  %v165_v36 = vld [vmem:[#allocation5 + $0x308] sm:$0xff]  ;;  %v878_v40 = vpack.c.bf16 %v162_v32, %v160_v31  ;;  %v310_v31 = vld [vmem:[#allocation5 + $0x790] sm:$0xff]  ;;  %v315_v35 = vld [vmem:[#allocation5 + $0x7b8] sm:$0xff] }
  0x83   :  { %v185_v32 = vld [vmem:[#allocation5 + $0x3a8] sm:$0xff]  ;;  %v191_v45 = vld [vmem:[#allocation5 + $0x3d8] sm:$0xff]  ;;  %v188_v51 = vld [vmem:[#allocation5 + $0x3c0] sm:$0xff] }
  0x84   :  { %859 = vmatpush1.bf16.msra.mxu1 %v858_v42  ;;  %v880_v42 = vpack.c.bf16 %v167_v37, %v165_v36  ;;  %v900_v38 = vpack.c.bf16 %v187_v33, %v185_v32  ;;  %v319_v47 = vld [vmem:[#allocation5 + $0x7d8] sm:$0xff]  ;;  %v192_v63 = vld [vmem:[#allocation5 + $0x3e0] sm:$0xff]  ;;  %v639_v5 = vld [vmem:[#allocation7 + $0x88] sm:$0xff] }
  0x85   :  { %987 = vmatpush1.bf16.msra.mxu0 %v986_v43  ;;  %861 = vmatprep.subr.bf16.mxu1 %v860_v44  ;;  %v164_v43 = vld [vmem:[#allocation5 + $0x300] sm:$0xff]  ;;  %v166_v44 = vld [vmem:[#allocation5 + $0x310] sm:$0xff]  ;;  %v195_v57 = vld [vmem:[#allocation5 + $0x3f8] sm:$0xff] }
  0x86   :  { %989 = vmatprep.subr.bf16.mxu0 %v988_v48  ;;  %v169_v48 = vld [vmem:[#allocation5 + $0x328] sm:$0xff]  ;;  %v882_v52 = vpack.c.bf16 %v166_v44, %v164_v43  ;;  %v314_v43 = vld [vmem:[#allocation5 + $0x7b0] sm:$0xff]  ;;  %v323_v59 = vld [vmem:[#allocation5 + $0x7f8] sm:$0xff] }
  0x87   :  { %v189_v44 = vld [vmem:[#allocation5 + $0x3c8] sm:$0xff]  ;;  %v640_v11 = vld [vmem:[#allocation7 + $0x90] sm:$0xff] }
  0x88   :  { %863 = vmatpush1.bf16.msra.mxu1 %v862_v54  ;;  %v884_v54 = vpack.c.bf16 %v171_v49, %v169_v48  ;;  %v904_v50 = vpack.c.bf16 %v191_v45, %v189_v44  ;;  %v623_v10 = vld [vmem:[#allocation7 + $0x8] sm:$0xff]  ;;  %v650_v44 = vld [vmem:[#allocation7 + $0xe0] sm:$0xff] }
  0x89   :  { %991 = vmatpush1.bf16.msra.mxu0 %v990_v55  ;;  %865 = vmatprep.subr.bf16.mxu1 %v864_v56  ;;  %v168_v55 = vld [vmem:[#allocation5 + $0x320] sm:$0xff]  ;;  %v170_v56 = vld [vmem:[#allocation5 + $0x330] sm:$0xff]  ;;  %v647_v32 = vld [vmem:[#allocation7 + $0xc8] sm:$0xff] }
  0x8a   :  { %993 = vmatprep.subr.bf16.mxu0 %v992_v60  ;;  %v173_v60 = vld [vmem:[#allocation5 + $0x348] sm:$0xff]  ;;  %v886_v0 = vpack.c.bf16 %v170_v56, %v168_v55  ;;  %v318_v55 = vld [vmem:[#allocation5 + $0x7d0] sm:$0xff] }
  0x8b   :  { %v193_v56 = vld [vmem:[#allocation5 + $0x3e8] sm:$0xff] }
  0x8c   :  { %867 = vmatpush1.bf16.msra.mxu1 %v866_v2  ;;  %v888_v2 = vpack.c.bf16 %v175_v61, %v173_v60  ;;  %v908_v62 = vpack.c.bf16 %v195_v57, %v193_v56  ;;  %v651_v45 = vld [vmem:[#allocation7 + $0xe8] sm:$0xff]  ;;  %v326_v56 = vlaneseq }
  0x8d   :  { %995 = vmatpush1.bf16.msra.mxu0 %v994_v3  ;;  %869 = vmatprep.subr.bf16.mxu1 %v868_v4  ;;  %v172_v3 = vld [vmem:[#allocation5 + $0x340] sm:$0xff]  ;;  %v174_v4 = vld [vmem:[#allocation5 + $0x350] sm:$0xff] }
  0x8e   :  { %997 = vmatprep.subr.bf16.mxu0 %v996_v8  ;;  %v177_v8 = vld [vmem:[#allocation5 + $0x368] sm:$0xff]  ;;  %v890_v12 = vpack.c.bf16 %v174_v4, %v172_v3  ;;  %v322_v3 = vld [vmem:[#allocation5 + $0x7f0] sm:$0xff]  ;;  %v638_v4 = vld [vmem:[#allocation7 + $0x80] sm:$0xff]  ;;  %v327_v57 = vshrl.u32 %v326_v56, 7 }
  0x90   :  { %871 = vmatpush1.bf16.msra.mxu1 %v870_v14  ;;  %v892_v14 = vpack.c.bf16 %v179_v9, %v177_v8  ;;  %v1040_v8 = vpack.c.bf16 %v639_v5, %v638_v4  ;;  %v622_v9 = vld [vmem:[#allocation7] sm:$0xff] }
  0x91   :  { %999 = vmatpush1.bf16.msra.mxu0 %v998_v16  ;;  %873 = vmatprep.subr.bf16.mxu1 %v872_v17  ;;  %v178_v16 = vld [vmem:[#allocation5 + $0x370] sm:$0xff]  ;;  %v304_v17 = vld [vmem:[#allocation5 + $0x760] sm:$0xff] }
  0x92   :  { %1001 = vmatprep.subr.bf16.mxu0 %v1000_v21  ;;  %v183_v21 = vld [vmem:[#allocation5 + $0x398] sm:$0xff]  ;;  %v894_v24 = vpack.c.bf16 %v178_v16, %v176_v15  ;;  %v1022_v25 = vpack.c.bf16 %v306_v19, %v304_v17  ;;  %v66_v15 = vld [vmem:[#allocation2 + $0x30] sm:$0xff]  ;;  %v642_v19 = vld [vmem:[#allocation7 + $0xa0] sm:$0xff] }
  0x93   :  { %v896_v26 = vpack.c.bf16 %v183_v21, %v181_v20  ;;  %v624_v17 = vld [vmem:[#allocation7 + $0x10] sm:$0xff]  ;;  %v643_v20 = vld [vmem:[#allocation7 + $0xa8] sm:$0xff] }
  0x94   :  { %875 = vmatpush1.bf16.msra.mxu1 %v874_v28  ;;  %v182_v28 = vld [vmem:[#allocation5 + $0x390] sm:$0xff] }
  0x95   :  { %1003 = vmatpush1.bf16.msra.mxu0 %v1002_v29  ;;  %877 = vmatprep.subr.bf16.mxu1 %v876_v30  ;;  %v308_v29 = vld [vmem:[#allocation5 + $0x780] sm:$0xff]  ;;  %v1024_v30 = vpack.c.bf16 %v311_v23, %v309_v22  ;;  %v898_v36 = vpack.c.bf16 %v182_v28, %v180_v27  ;;  %v1048_v22 = vpack.c.bf16 %v643_v20, %v642_v19 }
  0x96   :  { %1005 = vmatprep.subr.bf16.mxu0 %v1004_v34  ;;  %v313_v34 = vld [vmem:[#allocation5 + $0x7a8] sm:$0xff]  ;;  %v1026_v37 = vpack.c.bf16 %v310_v31, %v308_v29  ;;  %v626_v23 = vld [vmem:[#allocation7 + $0x20] sm:$0xff]  ;;  %v628_v29 = vld [vmem:[#allocation7 + $0x30] sm:$0xff] }
  0x97   :  { %v646_v31 = vld [vmem:[#allocation7 + $0xc0] sm:$0xff] }
  0x98   :  { %879 = vmatpush1.bf16.msra.mxu1 %v878_v40  ;;  %v186_v40 = vld [vmem:[#allocation5 + $0x3b0] sm:$0xff] }
  0x99   :  { %1007 = vmatpush1.bf16.msra.mxu0 %v1006_v41  ;;  %881 = vmatprep.subr.bf16.mxu1 %v880_v42  ;;  %v312_v41 = vld [vmem:[#allocation5 + $0x7a0] sm:$0xff]  ;;  %v1028_v42 = vpack.c.bf16 %v315_v35, %v313_v34  ;;  %v902_v48 = vpack.c.bf16 %v186_v40, %v184_v39  ;;  %v1056_v34 = vpack.c.bf16 %v647_v32, %v646_v31 }
  0x9a   :  { %1009 = vmatprep.subr.bf16.mxu0 %v1008_v46  ;;  %v317_v46 = vld [vmem:[#allocation5 + $0x7c8] sm:$0xff]  ;;  %v1030_v49 = vpack.c.bf16 %v314_v43, %v312_v41  ;;  %v630_v35 = vld [vmem:[#allocation7 + $0x40] sm:$0xff]  ;;  %v632_v41 = vld [vmem:[#allocation7 + $0x50] sm:$0xff] }
  0x9c   :  { %883 = vmatpush1.bf16.msra.mxu1 %v882_v52  ;;  %v190_v52 = vld [vmem:[#allocation5 + $0x3d0] sm:$0xff] }
  0x9d   :  { %1011 = vmatpush1.bf16.msra.mxu0 %v1010_v53  ;;  %885 = vmatprep.subr.bf16.mxu1 %v884_v54  ;;  %v316_v53 = vld [vmem:[#allocation5 + $0x7c0] sm:$0xff]  ;;  %v1032_v54 = vpack.c.bf16 %v319_v47, %v317_v46  ;;  %v906_v60 = vpack.c.bf16 %v190_v52, %v188_v51  ;;  %v1064_v46 = vpack.c.bf16 %v651_v45, %v650_v44  ;;  %v653_v51 = vld [vmem:[#allocation7 + $0xf8] sm:$0xff] }
  0x9e   :  { %1013 = vmatprep.subr.bf16.mxu0 %v1012_v58  ;;  %v321_v58 = vld [vmem:[#allocation5 + $0x7e8] sm:$0xff]  ;;  %v1034_v61 = vpack.c.bf16 %v318_v55, %v316_v53  ;;  %v634_v47 = vld [vmem:[#allocation7 + $0x60] sm:$0xff]  ;;  %v636_v53 = vld [vmem:[#allocation7 + $0x70] sm:$0xff] }
  0xa0   :  { %887 = vmatpush1.bf16.msra.mxu1 %v886_v0  ;;  %v194_v0 = vld [vmem:[#allocation5 + $0x3f0] sm:$0xff] }
  0xa1   :  { %1015 = vmatpush1.bf16.msra.mxu0 %v1014_v1  ;;  %889 = vmatprep.subr.bf16.mxu1 %v888_v2  ;;  %v320_v1 = vld [vmem:[#allocation5 + $0x7e0] sm:$0xff]  ;;  %v1036_v2 = vpack.c.bf16 %v323_v59, %v321_v58  ;;  %v328_v58 = vsub.s32 0, %v327_v57 }
  0xa2   :  { %1017 = vmatprep.subr.bf16.mxu0 %v1016_v6  ;;  %v910_v6 = vpack.c.bf16 %v194_v0, %v192_v63  ;;  %v1038_v7 = vpack.c.bf16 %v322_v3, %v320_v1  ;;  %v324_v59 = vld [vmem:[%s1276_s2] sm:$0x3]  ;;  %s1189_s2 = smov [#allocation8]  }
  0xa3   :  { %s738_s9 = sshll.u32 %s1189_s2, 4  ;;  %s739_s9 = int_to_ptr.vmem [resolvable:$true] %s738_s9 }
  0xa4   :  { %891 = vmatpush1.bf16.msra.mxu1 %v890_v12  ;;  %v641_v12 = vld [vmem:[#allocation7 + $0x98] sm:$0xff]  ;;  %s1154_s10 = scalar_lea.vmem %s739_s9, 128  ;;  %p1159_p11 = scmp.lt.s32.totalorder %s739_s9, %s739_s9 }
  0xa5   :  { %1019 = vmatpush1.bf16.msra.mxu0 %v1018_v13  ;;  %893 = vmatprep.subr.bf16.mxu1 %v892_v14  ;;  %v62_v13 = vld [vmem:[#allocation2 + $0x10] sm:$0xff]  ;;  %v1042_v14 = vpack.c.bf16 %v623_v10, %v622_v9  ;;  %v1044_v16 = vpack.c.bf16 %v641_v12, %v640_v11  ;;  %v748_v10 = vld [vmem:[%s1278_s4] ss:$0 sm:$0xff]  ;;  %p1155_p10 = scmp.ne.s32.totalorder %s739_s9, %s1154_s10  ;;  %p1160_p12 = scmp.lt.s32.totalorder %s1154_s10, %s1154_s10 }
  0xa6   :  { %1021 = vmatprep.subr.bf16.mxu0 %v1020_v18  ;;  %v625_v18 = vld [vmem:[#allocation7 + $0x18] sm:$0xff] }
  0xa7   :  { %v1046_v21 = vpack.c.bf16 %v625_v18, %v624_v17  ;;  %p1161_p13 = por %p1160_p12, %p1159_p11 }
  0xa8   :  { %895 = vmatpush1.bf16.msra.mxu1 %v894_v24  ;;  %v627_v24 = vld [vmem:[#allocation7 + $0x28] sm:$0xff] }
  0xa9   :  { %1023 = vmatpush1.bf16.msra.mxu0 %v1022_v25  ;;  %897 = vmatprep.subr.bf16.mxu1 %v896_v26  ;;  %v644_v25 = vld [vmem:[#allocation7 + $0xb0] sm:$0xff]  ;;  %v645_v26 = vld [vmem:[#allocation7 + $0xb8] sm:$0xff]  ;;  %v1050_v27 = vpack.c.bf16 %v627_v24, %v626_v23  ;;  %p1162_p0 = pnand %p1161_p13, %p1155_p10 }
  0xaa   :  { %1025 = vmatprep.subr.bf16.mxu0 %v1024_v30  ;;  %v1052_v28 = vpack.c.bf16 %v645_v26, %v644_v25  ;;  %v629_v30 = vld [vmem:[#allocation7 + $0x38] sm:$0xff] }
  0xab   :  { %v1054_v33 = vpack.c.bf16 %v629_v30, %v628_v29 }
  0xac   :  { %899 = vmatpush1.bf16.msra.mxu1 %v898_v36  ;;  %v631_v36 = vld [vmem:[#allocation7 + $0x48] sm:$0xff] }
  0xad   :  { %1027 = vmatpush1.bf16.msra.mxu0 %v1026_v37  ;;  %901 = vmatprep.subr.bf16.mxu1 %v900_v38  ;;  %v648_v37 = vld [vmem:[#allocation7 + $0xd0] sm:$0xff]  ;;  %v649_v38 = vld [vmem:[#allocation7 + $0xd8] sm:$0xff]  ;;  %v1058_v39 = vpack.c.bf16 %v631_v36, %v630_v35 }
  0xae   :  { %1029 = vmatprep.subr.bf16.mxu0 %v1028_v42  ;;  %v1060_v40 = vpack.c.bf16 %v649_v38, %v648_v37  ;;  %v633_v42 = vld [vmem:[#allocation7 + $0x58] sm:$0xff] }
  0xaf   :  { %v1062_v43 = vpack.c.bf16 %v633_v42, %v632_v41 }
  0xb0   :  { %903 = vmatpush1.bf16.msra.mxu1 %v902_v48  ;;  %v635_v48 = vld [vmem:[#allocation7 + $0x68] sm:$0xff] }
  0xb1   :  { %1031 = vmatpush1.bf16.msra.mxu0 %v1030_v49  ;;  %905 = vmatprep.subr.bf16.mxu1 %v904_v50  ;;  %v1066_v49 = vpack.c.bf16 %v635_v48, %v634_v47  ;;  %v652_v50 = vld [vmem:[#allocation7 + $0xf0] sm:$0xff] }
  0xb2   :  { %1033 = vmatprep.subr.bf16.mxu0 %v1032_v54  ;;  %v1068_v52 = vpack.c.bf16 %v653_v51, %v652_v50  ;;  %v637_v54 = vld [vmem:[#allocation7 + $0x78] sm:$0xff] }
  0xb3   :  { %v1070_v55 = vpack.c.bf16 %v637_v54, %v636_v53 }
  0xb4   :  { %907 = vmatpush1.bf16.msra.mxu1 %v906_v60  ;;  %v332_v60 = vsub.s32 1, %v327_v57 }
  0xb5   :  { %1035 = vmatpush1.bf16.msra.mxu0 %v1034_v61  ;;  %909 = vmatprep.subr.bf16.mxu1 %v908_v62  ;;  %v329_v61 = vrot.slane %v324_v59, %v328_v58 }
  0xb6   :  { %1037 = vmatprep.subr.bf16.mxu0 %v1036_v2  ;;  %v333_v62 = vrot.slane %v324_v59, %v332_v60 }
  0xb8   :  { %911 = vmatpush1.bf16.msra.mxu1 %v910_v6 }
  0xb9   :  { %1039 = vmatpush1.bf16.msra.mxu0 %v1038_v7  ;;  %1041 = vmatprep.subr.bf16.mxu1 %v1040_v8 }
  0xbb   :  { %472 = vmatmul.mubr.f32.vlgmr.msra.gmra.mrb[0].mxu1 %v62_v13 }
  0xbc   :  { %614 = vmatmul.mubr.f32.vlgmr.msra.gmra.mrb[0].mxu0 %v66_v15  ;;  %1043 = vmatpush3.bf16.msra.mxu1 %v1042_v14 }
  0xbd   :  { %1045 = vmatprep.subr.bf16.mxu1 %v1044_v16 }
  0xc0   :  { %1047 = vmatpush3.bf16.msra.mxu1 %v1046_v21 }
  0xc1   :  { %1049 = vmatprep.subr.bf16.mxu1 %v1048_v22 }
  0xc4   :  { %1051 = vmatpush3.bf16.msra.mxu1 %v1050_v27 }
  0xc5   :  { %1053 = vmatprep.subr.bf16.mxu1 %v1052_v28 }
  0xc8   :  { %1055 = vmatpush3.bf16.msra.mxu1 %v1054_v33 }
  0xc9   :  { %1057 = vmatprep.subr.bf16.mxu1 %v1056_v34 }
  0xcc   :  { %1059 = vmatpush3.bf16.msra.mxu1 %v1058_v39 }
  0xcd   :  { %1061 = vmatprep.subr.bf16.mxu1 %v1060_v40 }
  0xd0   :  { %1063 = vmatpush3.bf16.msra.mxu1 %v1062_v43 }
  0xd1   :  { %1065 = vmatprep.subr.bf16.mxu1 %v1064_v46 }
  0xd4   :  { %1067 = vmatpush3.bf16.msra.mxu1 %v1066_v49 }
  0xd5   :  { %1069 = vmatprep.subr.bf16.mxu1 %v1068_v52 }
  0xd8   :  { %1071 = vmatpush3.bf16.msra.mxu1 %v1070_v55 }
 0x18e   :  { %v473_v63 = vpop.f32.mrb[0].mxu1 }
 0x18f   :  { %v1072_v0 = vadd.f32 %v473_v63, %v329_v61  ;;  %v615_v1 = vpop.f32.mrb[0].mxu0  ;;  %v475_v2 = vpop.f32.mrb[1].mxu1 }
 0x190   :  { %v1074_v3 = vadd.f32 %v475_v2, %v333_v62  ;;  %v617_v4 = vpop.f32.mrb[1].mxu0 }
 0x191   :  { %v1073_v5 = vadd.f32 %v1072_v0, %v615_v1 }
 0x192   :  { %v1075_v6 = vadd.f32 %v1074_v3, %v617_v4 }
 0x193   :  { %v620_v8 = vmax.f32 %v1073_v5, 0.0 }
 0x194   :  { %v621_v7 = vmax.f32 %v1075_v6, 0.0 }
 0x196   :  { %725 = vmatprep.mubr.f32.mxu1 %v621_v7 }
 0x197   :  { %726 = vmatmul.mubr.f32.vlgmr.msra.gmra.mrb[2].mxu1 %v620_v8 }
 0x26a   :  { %v781_v9 = vpop.f32.mrb[2].mxu1 }
 0x26b   :  { %v782_v11 = vpop.f32.mrb[3].mxu1 }
 0x26c   :  { %v783_v12 = vadd.f32 %v782_v11, %v781_v9 }
 0x26e   :  { %v728_v13 = vadd.f32 %v783_v12, %v748_v10 }
 0x270   :  { %731 = vst [vmem:[#allocation8] sm:$0xff] %v728_v13 }
 0x271   :  { %1165 = shalt.err (!%p1162_p0)
}
 0x272   :  { %s1166_s13 = scalar_lea.hbm %s1279_s5, 128 }
 0x273   :  { %p1167_p1 = scmp.ne.s32.totalorder %s1279_s5, %s1166_s13  ;;  %p1170_p2 = scmp.lt.u32.totalorder %s1166_s13, %s1279_s5 }
 0x275   :  { %p1172_p3 = pnand %p1170_p2, %p1167_p1 }
 0x277   :  { %1175 = shalt.err (!%p1172_p3)
}
 0x278   :  { %741 = dma.vmem_to_hbm [thread:$0]  %s739_s9, 128, %s1279_s5, [#allocation4]  }
 0x279   :  { %1180 = dma.done.wait [#allocation4], 128  }
 0x27a   :  { %1181 = vsyncadd [#allocation4], 4294967168 }
 0x27b   :  { %745 = vsyncpa [#allocation3], 1 }
 0x27c   :  { %746 = vsyncpa [#allocation6], 1 }
 0x27d   :  { %747 = vsyncpa [#allocation4], 1 }

</bundles_post_ra>
